<compile_context>
chip_gen: v5e
topology: v5e:2x2
jax: 0.10.0
libtpu: 0.0.40
codegen_flags: <defaults>
</compile_context>

<pallas_src>
import functools

import jax
import jax.numpy as jnp
from jax.experimental import pallas as pl
from jax.experimental.pallas import tpu as pltpu

LANE = 128
SUBLANE = 8


def _round_up(x, m):
    return ((x + m - 1) // m) * m


def _pick_row_tile(n, tm_max=256):
    """Row tile that is sublane-aligned and not mostly padding for awkward N."""
    rows = _round_up(n, SUBLANE)
    if rows <= tm_max:
        return rows, rows
    n_tiles = -(-rows // tm_max)                    # cdiv
    tm = _round_up(-(-rows // n_tiles), SUBLANE)
    return tm, tm * n_tiles


def _backbone_kernel(x_ref, *refs, layer_meta):
    """Whole FF stack for one row tile.

    refs layout: (w_0, p_0, w_1, p_1, ..., w_{L-1}, p_{L-1}, o_ref).
    p_l is an (8, d_out_p) f32 slab: rows 0/1/2 = bias / BN scale / BN shift.
    """
    n_layers = len(layer_meta)
    o_ref = refs[2 * n_layers]

    h = x_ref[...].astype(jnp.float32)              # activation stays on-chip (f32)
    for l, (apply_relu, apply_affine, residual) in enumerate(layer_meta):
        w_ref = refs[2 * l]
        p_ref = refs[2 * l + 1]
        # bf16 operands feed the MXU at native rate; accumulate in f32.
        y = jnp.dot(h.astype(w_ref.dtype), w_ref[...],
                    preferred_element_type=jnp.float32)
        p = p_ref[...]
        y = y + p[0:1, :]                           # Linear bias
        if apply_relu:
            y = jnp.maximum(y, 0.0)                 # ReLU
        if apply_affine:
            y = y * p[1:2, :] + p[2:3, :]           # folded eval-mode BatchNorm1d
        if residual:
            y = y + h                               # FFBlock residual (dims equal)
        h = y
    o_ref[...] = h.astype(o_ref.dtype)


def prepare_backbone_params(ff_layers, out_w, out_b, *, residual=True,
                            eps=1e-5, compute_dtype=jnp.bfloat16):
    """Fold BN, pad to lane multiples and cast ONCE (constant across calls).

    ff_layers: list of (w[in,out], b, gamma, beta, running_mean, running_var).
    Returns a list of per-layer dicts consumed by backbone_apply.
    """
    raw = []
    for (w, b, gamma, beta, mean, var) in ff_layers:
        scale = gamma / jnp.sqrt(var + eps)
        shift = beta - mean * scale
        raw.append((w, b, scale, shift, True, True,
                    bool(residual) and w.shape[0] == w.shape[1]))
    # fc_out: plain Linear (dropout identity at eval), no ReLU / norm / residual.
    raw.append((out_w, out_b, None, None, False, False, False))

    prepared = []
    for (w, b, scale, shift, relu, affine, res) in raw:
        d_in, d_out = w.shape
        d_in_p = _round_up(d_in, LANE)
        d_out_p = _round_up(d_out, LANE)
        w_p = jnp.pad(w, ((0, d_in_p - d_in), (0, d_out_p - d_out))).astype(compute_dtype)
        params = jnp.zeros((SUBLANE, d_out_p), jnp.float32)
        params = params.at[0, :d_out].set(b.astype(jnp.float32))
        if affine:
            params = params.at[1, :d_out].set(scale.astype(jnp.float32))
            params = params.at[2, :d_out].set(shift.astype(jnp.float32))
        prepared.append(dict(w=w_p, params=params, d_in=d_in, d_out=d_out,
                             relu=relu, affine=affine, residual=res))
    return prepared


def backbone_apply(fingerprints, prepared, *, compute_dtype=jnp.bfloat16,
                   out_dtype=None, tm_max=256):
    """Fused Backbone eval forward: fingerprints -> fc0..fcL -> fc_out."""
    N, d_in0 = fingerprints.shape
    assert d_in0 == prepared[0]["d_in"], "fingerprint dim mismatch"
    out_dtype = out_dtype or fingerprints.dtype
    d_out_last = prepared[-1]["d_out"]

    tm, n_p = _pick_row_tile(N, tm_max)
    d_in0_p = prepared[0]["w"].shape[0]
    d_out_last_p = prepared[-1]["w"].shape[1]

    # Single pad + cast of the activation input (read once per row tile).
    x_p = jnp.pad(fingerprints,
                  ((0, n_p - N), (0, d_in0_p - d_in0))).astype(compute_dtype)

    inputs = [x_p]
    in_specs = [pl.BlockSpec((tm, d_in0_p), lambda i: (i, 0))]
    layer_meta = []
    for lp in prepared:
        inputs += [lp["w"], lp["params"]]
        # Constant index_map -> fetched into VMEM once, resident across row tiles.
        in_specs += [pl.BlockSpec(lp["w"].shape, lambda i: (0, 0)),
                     pl.BlockSpec(lp["params"].shape, lambda i: (0, 0))]
        layer_meta.append((lp["relu"], lp["affine"], lp["residual"]))

    # VMEM budget: resident weights/params (x2 for pipelining buffers), the
    # double-buffered x / out row tiles, plus f32 activation working set.
    weight_bytes = sum(int(a.size) * a.dtype.itemsize for a in inputs[1:])
    io_bytes = 2 * tm * d_in0_p * x_p.dtype.itemsize \
             + 2 * tm * d_out_last_p * jnp.dtype(out_dtype).itemsize
    max_width = max(d_in0_p, *(lp["w"].shape[1] for lp in prepared))
    act_bytes = 4 * tm * max_width * 4
    vmem_limit = int(min(64 * 2**20,
                         max(32 * 2**20,
                             2 * weight_bytes + io_bytes + act_bytes + (4 << 20))))

    out = pl.pallas_call(
        functools.partial(_backbone_kernel, layer_meta=tuple(layer_meta)),
        out_shape=jax.ShapeDtypeStruct((n_p, d_out_last_p), out_dtype),
        grid_spec=pltpu.PrefetchScalarGridSpec(
            num_scalar_prefetch=0,
            grid=(n_p // tm,),                       # rows only; all layers fused
            in_specs=in_specs,
            out_specs=pl.BlockSpec((tm, d_out_last_p), lambda i: (i, 0)),
        ),
        compiler_params=pltpu.CompilerParams(
            dimension_semantics=("parallel",),       # row tiles shard across TCs (v7x)
            vmem_limit_bytes=vmem_limit),
    )(*inputs)

    return out[:N, :d_out_last]


def backbone_forward(fingerprints, ff_layers, out_w, out_b, *, residual=True,
                     eps=1e-5, compute_dtype=jnp.bfloat16):
    """Convenience wrapper: prepare params + run the fused kernel."""
    prepared = prepare_backbone_params(ff_layers, out_w, out_b,
                                       residual=residual, eps=eps,
                                       compute_dtype=compute_dtype)
    return backbone_apply(fingerprints, prepared, compute_dtype=compute_dtype)


if __name__ == "__main__":
    # Small shapes consistent with the module: batch=16, ECFP dim=256 (stand-in
    # for 2048), fc_hidden_dim=64, fc_layers=2 (-> fc0, fc1, fc2), fc_out_dim=32.
    # fc0 changes width (no residual, like production); fc1/fc2 are residual.
    N, D_FP, D_HID, D_OUT, FC_LAYERS = 16, 256, 64, 32, 2
    RESIDUAL, EPS = True, 1e-5
    key = jax.random.PRNGKey(0)

    key, kx = jax.random.split(key)
    fingerprints = jax.random.normal(kx, (N, D_FP), dtype=jnp.float32)

    ff_layers = []
    d_prev = D_FP
    for _ in range(FC_LAYERS + 1):                  # fc0 .. fc{FC_LAYERS}
        key, kw, kb, kg, kbe, km, kv = jax.random.split(key, 7)
        # PyTorch nn.Linear weight is [D_out, D_in]; store transposed [D_in, D_out].
        w = (jax.random.normal(kw, (D_HID, d_prev), dtype=jnp.float32) * 0.1).T
        b = jax.random.normal(kb, (D_HID,), dtype=jnp.float32) * 0.1
        gamma = 1.0 + 0.1 * jax.random.normal(kg, (D_HID,), dtype=jnp.float32)
        beta = 0.1 * jax.random.normal(kbe, (D_HID,), dtype=jnp.float32)
        mean = 0.1 * jax.random.normal(km, (D_HID,), dtype=jnp.float32)
        var = jnp.abs(1.0 + 0.1 * jax.random.normal(kv, (D_HID,), dtype=jnp.float32))
        ff_layers.append((w, b, gamma, beta, mean, var))
        d_prev = D_HID

    key, kw, kb = jax.random.split(key, 3)
    out_w = (jax.random.normal(kw, (D_OUT, D_HID), dtype=jnp.float32) * 0.1).T
    out_b = jax.random.normal(kb, (D_OUT,), dtype=jnp.float32) * 0.1

    out = backbone_forward(fingerprints, ff_layers, out_w, out_b, residual=RESIDUAL)
    out = jax.block_until_ready(out)
    assert out.shape == (N, D_OUT), f"bad shape {out.shape}"

    # Pure-JAX f32 reference (module semantics, eval mode) — loose tolerance
    # because the kernel uses bf16 matmul operands with f32 accumulation.
    h = fingerprints
    for (w, b, gamma, beta, mean, var) in ff_layers:
        y = jnp.maximum(h @ w + b, 0.0)
        y = (y - mean) / jnp.sqrt(var + EPS) * gamma + beta
        h = h + y if (RESIDUAL and w.shape[0] == w.shape[1]) else y
    ref_f32 = h @ out_w + out_b
    assert jnp.allclose(out, ref_f32, atol=5e-2, rtol=5e-2), "mismatch vs f32 reference"

    # Matched-precision reference (bf16 matmul operands, f32 accumulate/epilogue).
    bf16 = jnp.bfloat16
    h = fingerprints.astype(bf16).astype(jnp.float32)
    for (w, b, gamma, beta, mean, var) in ff_layers:
        scale = gamma / jnp.sqrt(var + EPS)
        shift = beta - mean * scale
        y = jnp.dot(h.astype(bf16), w.astype(bf16), preferred_element_type=jnp.float32)
        y = jnp.maximum(y + b, 0.0) * scale + shift
        h = h + y if (RESIDUAL and w.shape[0] == w.shape[1]) else y
    ref_match = jnp.dot(h.astype(bf16), out_w.astype(bf16),
                        preferred_element_type=jnp.float32) + out_b
    assert jnp.allclose(out, ref_match, atol=2e-3, rtol=2e-3), \
        "mismatch vs matched-precision reference"

    print("KERNEL_OK")
</pallas_src>

<mosaic_0001>
module attributes {stable_mosaic.version = 11 : i64} {
  func.func @_backbone_kernel(%arg0: i32, %arg1: memref<16x256xbf16, #tpu.memory_space<vmem>>, %arg2: memref<256x128xbf16, #tpu.memory_space<vmem>>, %arg3: memref<8x128xf32, #tpu.memory_space<vmem>>, %arg4: memref<128x128xbf16, #tpu.memory_space<vmem>>, %arg5: memref<8x128xf32, #tpu.memory_space<vmem>>, %arg6: memref<128x128xbf16, #tpu.memory_space<vmem>>, %arg7: memref<8x128xf32, #tpu.memory_space<vmem>>, %arg8: memref<128x128xbf16, #tpu.memory_space<vmem>>, %arg9: memref<8x128xf32, #tpu.memory_space<vmem>>, %arg10: memref<16x128xf32, #tpu.memory_space<vmem>>) attributes {dimension_semantics = [#tpu.dimension_semantics<parallel>], iteration_bounds = array<i64: 1>, scalar_prefetch = 0 : i64, scratch_operands = 0 : i64, tpu.core_type = #tpu.core_type<tc>, window_params = [{transform_indices = @transform_0, window_bounds = array<i64: 16, 256>}, {pipeline_mode = #tpu.pipeline_mode<synchronous>, transform_indices = @transform_1, window_bounds = array<i64: 256, 128>}, {pipeline_mode = #tpu.pipeline_mode<synchronous>, transform_indices = @transform_2, window_bounds = array<i64: 8, 128>}, {pipeline_mode = #tpu.pipeline_mode<synchronous>, transform_indices = @transform_3, window_bounds = array<i64: 128, 128>}, {pipeline_mode = #tpu.pipeline_mode<synchronous>, transform_indices = @transform_4, window_bounds = array<i64: 8, 128>}, {pipeline_mode = #tpu.pipeline_mode<synchronous>, transform_indices = @transform_5, window_bounds = array<i64: 128, 128>}, {pipeline_mode = #tpu.pipeline_mode<synchronous>, transform_indices = @transform_6, window_bounds = array<i64: 8, 128>}, {pipeline_mode = #tpu.pipeline_mode<synchronous>, transform_indices = @transform_7, window_bounds = array<i64: 128, 128>}, {pipeline_mode = #tpu.pipeline_mode<synchronous>, transform_indices = @transform_8, window_bounds = array<i64: 8, 128>}, {transform_indices = @transform_9, window_bounds = array<i64: 16, 128>}]} {
    %c0 = arith.constant 0 : index
    %c0_0 = arith.constant 0 : index
    %0 = vector.load %arg1[%c0, %c0_0] : memref<16x256xbf16, #tpu.memory_space<vmem>>, vector<16x256xbf16>
    %1 = arith.extf %0 : vector<16x256xbf16> to vector<16x256xf32>
    %2 = arith.truncf %1 : vector<16x256xf32> to vector<16x256xbf16>
    %c0_1 = arith.constant 0 : index
    %c0_2 = arith.constant 0 : index
    %3 = vector.load %arg2[%c0_1, %c0_2] : memref<256x128xbf16, #tpu.memory_space<vmem>>, vector<256x128xbf16>
    %cst = arith.constant dense<0.000000e+00> : vector<16x128xf32>
    %4 = tpu.matmul %2, %3, %cst {dimension_numbers = #tpu.dot_dimension_numbers<[1], [0], [0], [1], [0, 0, 1, 1], [], []>} : vector<16x256xbf16>, vector<256x128xbf16>, vector<16x128xf32> -> vector<16x128xf32>
    %c0_3 = arith.constant 0 : index
    %c0_4 = arith.constant 0 : index
    %5 = vector.load %arg3[%c0_3, %c0_4] : memref<8x128xf32, #tpu.memory_space<vmem>>, vector<8x128xf32>
    %6 = vector.extract_strided_slice %5 {offsets = [0, 0], sizes = [1, 128], strides = [1, 1]} : vector<8x128xf32> to vector<1x128xf32>
    %7 = vector.broadcast %6 : vector<1x128xf32> to vector<16x128xf32>
    %8 = arith.addf %4, %7 : vector<16x128xf32>
    %cst_5 = arith.constant 0.000000e+00 : f32
    %9 = vector.broadcast %cst_5 : f32 to vector<16x128xf32>
    %10 = arith.maximumf %8, %9 : vector<16x128xf32>
    %11 = vector.extract_strided_slice %5 {offsets = [1, 0], sizes = [1, 128], strides = [1, 1]} : vector<8x128xf32> to vector<1x128xf32>
    %12 = vector.broadcast %11 : vector<1x128xf32> to vector<16x128xf32>
    %13 = arith.mulf %10, %12 : vector<16x128xf32>
    %14 = vector.extract_strided_slice %5 {offsets = [2, 0], sizes = [1, 128], strides = [1, 1]} : vector<8x128xf32> to vector<1x128xf32>
    %15 = vector.broadcast %14 : vector<1x128xf32> to vector<16x128xf32>
    %16 = arith.addf %13, %15 : vector<16x128xf32>
    %17 = arith.truncf %16 : vector<16x128xf32> to vector<16x128xbf16>
    %c0_6 = arith.constant 0 : index
    %c0_7 = arith.constant 0 : index
    %18 = vector.load %arg4[%c0_6, %c0_7] : memref<128x128xbf16, #tpu.memory_space<vmem>>, vector<128x128xbf16>
    %cst_8 = arith.constant dense<0.000000e+00> : vector<16x128xf32>
    %19 = tpu.matmul %17, %18, %cst_8 {dimension_numbers = #tpu.dot_dimension_numbers<[1], [0], [0], [1], [0, 0, 1, 1], [], []>} : vector<16x128xbf16>, vector<128x128xbf16>, vector<16x128xf32> -> vector<16x128xf32>
    %c0_9 = arith.constant 0 : index
    %c0_10 = arith.constant 0 : index
    %20 = vector.load %arg5[%c0_9, %c0_10] : memref<8x128xf32, #tpu.memory_space<vmem>>, vector<8x128xf32>
    %21 = vector.extract_strided_slice %20 {offsets = [0, 0], sizes = [1, 128], strides = [1, 1]} : vector<8x128xf32> to vector<1x128xf32>
    %22 = vector.broadcast %21 : vector<1x128xf32> to vector<16x128xf32>
    %23 = arith.addf %19, %22 : vector<16x128xf32>
    %cst_11 = arith.constant 0.000000e+00 : f32
    %24 = vector.broadcast %cst_11 : f32 to vector<16x128xf32>
    %25 = arith.maximumf %23, %24 : vector<16x128xf32>
    %26 = vector.extract_strided_slice %20 {offsets = [1, 0], sizes = [1, 128], strides = [1, 1]} : vector<8x128xf32> to vector<1x128xf32>
    %27 = vector.broadcast %26 : vector<1x128xf32> to vector<16x128xf32>
    %28 = arith.mulf %25, %27 : vector<16x128xf32>
    %29 = vector.extract_strided_slice %20 {offsets = [2, 0], sizes = [1, 128], strides = [1, 1]} : vector<8x128xf32> to vector<1x128xf32>
    %30 = vector.broadcast %29 : vector<1x128xf32> to vector<16x128xf32>
    %31 = arith.addf %28, %30 : vector<16x128xf32>
    %32 = arith.addf %31, %16 : vector<16x128xf32>
    %33 = arith.truncf %32 : vector<16x128xf32> to vector<16x128xbf16>
    %c0_12 = arith.constant 0 : index
    %c0_13 = arith.constant 0 : index
    %34 = vector.load %arg6[%c0_12, %c0_13] : memref<128x128xbf16, #tpu.memory_space<vmem>>, vector<128x128xbf16>
    %cst_14 = arith.constant dense<0.000000e+00> : vector<16x128xf32>
    %35 = tpu.matmul %33, %34, %cst_14 {dimension_numbers = #tpu.dot_dimension_numbers<[1], [0], [0], [1], [0, 0, 1, 1], [], []>} : vector<16x128xbf16>, vector<128x128xbf16>, vector<16x128xf32> -> vector<16x128xf32>
    %c0_15 = arith.constant 0 : index
    %c0_16 = arith.constant 0 : index
    %36 = vector.load %arg7[%c0_15, %c0_16] : memref<8x128xf32, #tpu.memory_space<vmem>>, vector<8x128xf32>
    %37 = vector.extract_strided_slice %36 {offsets = [0, 0], sizes = [1, 128], strides = [1, 1]} : vector<8x128xf32> to vector<1x128xf32>
    %38 = vector.broadcast %37 : vector<1x128xf32> to vector<16x128xf32>
    %39 = arith.addf %35, %38 : vector<16x128xf32>
    %cst_17 = arith.constant 0.000000e+00 : f32
    %40 = vector.broadcast %cst_17 : f32 to vector<16x128xf32>
    %41 = arith.maximumf %39, %40 : vector<16x128xf32>
    %42 = vector.extract_strided_slice %36 {offsets = [1, 0], sizes = [1, 128], strides = [1, 1]} : vector<8x128xf32> to vector<1x128xf32>
    %43 = vector.broadcast %42 : vector<1x128xf32> to vector<16x128xf32>
    %44 = arith.mulf %41, %43 : vector<16x128xf32>
    %45 = vector.extract_strided_slice %36 {offsets = [2, 0], sizes = [1, 128], strides = [1, 1]} : vector<8x128xf32> to vector<1x128xf32>
    %46 = vector.broadcast %45 : vector<1x128xf32> to vector<16x128xf32>
    %47 = arith.addf %44, %46 : vector<16x128xf32>
    %48 = arith.addf %47, %32 : vector<16x128xf32>
    %49 = arith.truncf %48 : vector<16x128xf32> to vector<16x128xbf16>
    %c0_18 = arith.constant 0 : index
    %c0_19 = arith.constant 0 : index
    %50 = vector.load %arg8[%c0_18, %c0_19] : memref<128x128xbf16, #tpu.memory_space<vmem>>, vector<128x128xbf16>
    %cst_20 = arith.constant dense<0.000000e+00> : vector<16x128xf32>
    %51 = tpu.matmul %49, %50, %cst_20 {dimension_numbers = #tpu.dot_dimension_numbers<[1], [0], [0], [1], [0, 0, 1, 1], [], []>} : vector<16x128xbf16>, vector<128x128xbf16>, vector<16x128xf32> -> vector<16x128xf32>
    %c0_21 = arith.constant 0 : index
    %c0_22 = arith.constant 0 : index
    %52 = vector.load %arg9[%c0_21, %c0_22] : memref<8x128xf32, #tpu.memory_space<vmem>>, vector<8x128xf32>
    %53 = vector.extract_strided_slice %52 {offsets = [0, 0], sizes = [1, 128], strides = [1, 1]} : vector<8x128xf32> to vector<1x128xf32>
    %54 = vector.broadcast %53 : vector<1x128xf32> to vector<16x128xf32>
    %55 = arith.addf %51, %54 : vector<16x128xf32>
    %c0_23 = arith.constant 0 : index
    %c0_24 = arith.constant 0 : index
    %56 = vector.load %arg10[%c0_23, %c0_24] : memref<16x128xf32, #tpu.memory_space<vmem>>, vector<16x128xf32>
    tpu.vector_store %arg10[%c0_23, %c0_24], %55 {strides = array<i32>} : memref<16x128xf32, #tpu.memory_space<vmem>>, vector<16x128xf32>,
    return
  }
  func.func @transform_0(%arg0: i32) -> (i32, i32) {
    %c0_i32 = arith.constant 0 : i32
    %c0_i32_0 = arith.constant 0 : i32
    return %arg0, %c0_i32 : i32, i32
  }
  func.func @transform_1(%arg0: i32) -> (i32, i32) {
    %c0_i32 = arith.constant 0 : i32
    %c0_i32_0 = arith.constant 0 : i32
    %c0_i32_1 = arith.constant 0 : i32
    return %c0_i32, %c0_i32_0 : i32, i32
  }
  func.func @transform_2(%arg0: i32) -> (i32, i32) {
    %c0_i32 = arith.constant 0 : i32
    %c0_i32_0 = arith.constant 0 : i32
    %c0_i32_1 = arith.constant 0 : i32
    return %c0_i32, %c0_i32_0 : i32, i32
  }
  func.func @transform_3(%arg0: i32) -> (i32, i32) {
    %c0_i32 = arith.constant 0 : i32
    %c0_i32_0 = arith.constant 0 : i32
    %c0_i32_1 = arith.constant 0 : i32
    return %c0_i32, %c0_i32_0 : i32, i32
  }
  func.func @transform_4(%arg0: i32) -> (i32, i32) {
    %c0_i32 = arith.constant 0 : i32
    %c0_i32_0 = arith.constant 0 : i32
    %c0_i32_1 = arith.constant 0 : i32
    return %c0_i32, %c0_i32_0 : i32, i32
  }
  func.func @transform_5(%arg0: i32) -> (i32, i32) {
    %c0_i32 = arith.constant 0 : i32
    %c0_i32_0 = arith.constant 0 : i32
    %c0_i32_1 = arith.constant 0 : i32
    return %c0_i32, %c0_i32_0 : i32, i32
  }
  func.func @transform_6(%arg0: i32) -> (i32, i32) {
    %c0_i32 = arith.constant 0 : i32
    %c0_i32_0 = arith.constant 0 : i32
    %c0_i32_1 = arith.constant 0 : i32
    return %c0_i32, %c0_i32_0 : i32, i32
  }
  func.func @transform_7(%arg0: i32) -> (i32, i32) {
    %c0_i32 = arith.constant 0 : i32
    %c0_i32_0 = arith.constant 0 : i32
    %c0_i32_1 = arith.constant 0 : i32
    return %c0_i32, %c0_i32_0 : i32, i32
  }
  func.func @transform_8(%arg0: i32) -> (i32, i32) {
    %c0_i32 = arith.constant 0 : i32
    %c0_i32_0 = arith.constant 0 : i32
    %c0_i32_1 = arith.constant 0 : i32
    return %c0_i32, %c0_i32_0 : i32, i32
  }
  func.func @transform_9(%arg0: i32) -> (i32, i32) {
    %c0_i32 = arith.constant 0 : i32
    %c0_i32_0 = arith.constant 0 : i32
    return %arg0, %c0_i32 : i32, i32
  }
}

</mosaic_0001>

<bundles_post_ra>
// kernel: tpu_custom_call.1
= control target key start
LH: loop header
LB: loop body
LE: loop exit
PB: predicated region body
PF: predicated region fallthrough
CT: control target
= control target key end

     0   :  { %14 = vsyncpa [#allocation3], 0  ;;  %s1207_s0 = inlined_call_operand.hbm [shape: bf16[16,256], index: 0, kind: input, shape index: {}]   ;;  %s1208_s1 = inlined_call_operand.hbm [shape: bf16[256,128], index: 1, kind: input, shape index: {}]   ;;  %s1209_s2 = inlined_call_operand.hbm [shape: f32[8,128], index: 2, kind: input, shape index: {}]   ;;  %s1210_s3 = inlined_call_operand.hbm [shape: bf16[128,128], index: 3, kind: input, shape index: {}]   ;;  %s1211_s4 = inlined_call_operand.hbm [shape: f32[8,128], index: 4, kind: input, shape index: {}]   ;;  %s1212_s5 = inlined_call_operand.hbm [shape: bf16[128,128], index: 5, kind: input, shape index: {}]   ;;  %s1213_s6 = inlined_call_operand.hbm [shape: f32[8,128], index: 6, kind: input, shape index: {}]   ;;  %s1214_s7 = inlined_call_operand.hbm [shape: bf16[128,128], index: 7, kind: input, shape index: {}]   ;;  %s1215_s8 = inlined_call_operand.hbm [shape: f32[8,128], index: 8, kind: input, shape index: {}]   ;;  %s1216_s9 = inlined_call_operand.hbm [shape: f32[16,128], index: 9, kind: output, shape index: {}]  }
   0x1   :  { %15 = vsyncpa [#allocation6], 0 }
   0x2   :  { %16 = vsyncpa [#allocation9], 0 }
   0x3   :  { %17 = vsyncpa [#allocation12], 0 }
   0x4   :  { %18 = vsyncpa [#allocation15], 0  ;;  %s37_s11 = sshll.u32 %s1208_s1, 4  ;;  %s38_s11 = int_to_ptr.hbm [resolvable:$true] %s37_s11 }
   0x5   :  { %19 = vsyncpa [#allocation4], 0  ;;  %s1107_s12 = smov [#allocation5]   ;;  %s61_s16 = sshll.u32 %s1210_s3, 4  ;;  %s62_s16 = int_to_ptr.hbm [resolvable:$true] %s61_s16 }
   0x6   :  { %s39_s13 = sshll.u32 %s1107_s12, 4  ;;  %s1108_s17 = smov 64   ;;  %s40_s13 = int_to_ptr.vmem [resolvable:$true] %s39_s13 }
   0x7   :  { %s1109_s18 = smov 4   ;;  %s1110_s19 = smov [#allocation8]  }
   0x8   :  { %45 = dma.hbm_to_vmem [thread:$0]  %s38_s11, 2048, %s40_s13, [#allocation6], %s1108_s17, %s1108_s17, %s1109_s18  }
   0x9   :  { %s63_s20 = sshll.u32 %s1110_s19, 4  ;;  %s85_s23 = sshll.u32 %s1212_s5, 4  ;;  %s64_s20 = int_to_ptr.vmem [resolvable:$true] %s63_s20  ;;  %s86_s23 = int_to_ptr.hbm [resolvable:$true] %s85_s23 }
   0xa   :  { %69 = dma.hbm_to_vmem [thread:$0]  %s62_s16, 1024, %s64_s20, [#allocation9], %s1108_s17, %s1108_s17, %s1109_s18  }
   0xb   :  { %s109_s25 = sshll.u32 %s1214_s7, 4  ;;  %s1111_s26 = smov [#allocation11]   ;;  %s110_s25 = int_to_ptr.hbm [resolvable:$true] %s109_s25 }
   0xc   :  { %s87_s27 = sshll.u32 %s1111_s26, 4  ;;  %s1112_s3 = smov [#allocation14]   ;;  %s88_s27 = int_to_ptr.vmem [resolvable:$true] %s87_s27 }
   0xd   :  { %93 = dma.hbm_to_vmem [thread:$0]  %s86_s23, 1024, %s88_s27, [#allocation12], %s1108_s17, %s1108_s17, %s1109_s18  }
   0xe   :  { %s111_s28 = sshll.u32 %s1112_s3, 4  ;;  %s24_s10 = sshll.u32 %s1207_s0, 4  ;;  %s112_s28 = int_to_ptr.vmem [resolvable:$true] %s111_s28  ;;  %s25_s10 = int_to_ptr.hbm [resolvable:$true] %s24_s10 }
   0xf   :  { %117 = dma.hbm_to_vmem [thread:$0]  %s110_s25, 1024, %s112_s28, [#allocation15], %s1108_s17, %s1108_s17, %s1109_s18  }
  0x10   :  { %s1113_s5 = smov [#allocation2]   ;;  %s51_s7 = sshll.u32 %s1209_s2, 4  ;;  %s52_s7 = int_to_ptr.hbm [resolvable:$true] %s51_s7 }
  0x11   :  { %s26_s11 = sshll.u32 %s1113_s5, 4  ;;  %s1114_s14 = smov 128   ;;  %s27_s11 = int_to_ptr.vmem [resolvable:$true] %s26_s11 }
  0x12   :  { %s1115_s15 = smov 8   ;;  %s1116_s16 = smov [#allocation7]  }
  0x13   :  { %32 = dma.hbm_to_vmem [thread:$0]  %s25_s10, 256, %s27_s11, [#allocation3], %s1114_s14, %s1114_s14, %s1115_s15  }
  0x14   :  { %s53_s19 = sshll.u32 %s1116_s16, 4  ;;  %s75_s17 = sshll.u32 %s1211_s4, 4  ;;  %s54_s19 = int_to_ptr.vmem [resolvable:$true] %s53_s19  ;;  %s76_s17 = int_to_ptr.hbm [resolvable:$true] %s75_s17 }
  0x15   :  { %56 = dma.hbm_to_vmem [thread:$0]  %s52_s7, 128, %s54_s19, [#allocation6]  }
  0x16   :  { %s99_s2 = sshll.u32 %s1213_s6, 4  ;;  %s1117_s22 = smov [#allocation10]   ;;  %s100_s2 = int_to_ptr.hbm [resolvable:$true] %s99_s2 }
  0x17   :  { %s77_s23 = sshll.u32 %s1117_s22, 4  ;;  %s1118_s1 = smov [#allocation13]   ;;  %s78_s23 = int_to_ptr.vmem [resolvable:$true] %s77_s23 }
  0x18   :  { %80 = dma.hbm_to_vmem [thread:$0]  %s76_s17, 128, %s78_s23, [#allocation9]  }
  0x19   :  { %s101_s24 = sshll.u32 %s1118_s1, 4  ;;  %s123_s27 = sshll.u32 %s1215_s8, 4  ;;  %s102_s24 = int_to_ptr.vmem [resolvable:$true] %s101_s24  ;;  %s124_s27 = int_to_ptr.hbm [resolvable:$true] %s123_s27 }
  0x1a   :  { %104 = dma.hbm_to_vmem [thread:$0]  %s100_s2, 128, %s102_s24, [#allocation12]  }
  0x1b   :  { %s1119_s4 = smov [#allocation16]  }
  0x1c   :  { %s125_s3 = sshll.u32 %s1119_s4, 4  ;;  %s126_s3 = int_to_ptr.vmem [resolvable:$true] %s125_s3 }
  0x1d   :  { %128 = dma.hbm_to_vmem [thread:$0]  %s124_s27, 128, %s126_s3, [#allocation15]  }
  0x1e   :  { %1095 = dma.done.wait [#allocation3], 256  }
  0x1f   :  { %1096 = vsyncadd [#allocation3], 4294967040 }
  0x20   :  { %1097 = dma.done.wait [#allocation6], 2176  }
  0x21   :  { %1098 = vsyncadd [#allocation6], 4294965120 }
  0x22   :  { %1099 = dma.done.wait [#allocation9], 1152  }
  0x23   :  { %1100 = vsyncadd [#allocation9], 4294966144 }
  0x24   :  { %1101 = dma.done.wait [#allocation12], 1152  }
  0x25   :  { %1102 = vsyncadd [#allocation12], 4294966144 }
  0x26   :  { %1103 = dma.done.wait [#allocation15], 1152  }
  0x27   :  { %1104 = vsyncadd [#allocation15], 4294966144  ;;  %v808_v0 = vld [vmem:[#allocation5 + $0x38] sm:$0xff]  ;;  %v807_v2 = vld [vmem:[#allocation5 + $0x30] sm:$0xff]  ;;  %s1120_s6 = smov [#allocation17]   ;;  %s614_s30 = sshll.u32 %s1216_s9, 4  ;;  %s615_s30 = int_to_ptr.hbm [resolvable:$true] %s614_s30 }
  0x28   :  { %v816_v1 = vld [vmem:[#allocation5 + $0x78] sm:$0xff]  ;;  %307 = vmatpush.bf16.msra.mxu0 %v808_v0  ;;  %v815_v3 = vld [vmem:[#allocation5 + $0x70] sm:$0xff]  ;;  %v806_v4 = vld [vmem:[#allocation5 + $0x28] sm:$0xff]  ;;  %s612_s8 = sshll.u32 %s1120_s6, 4  ;;  %s613_s8 = int_to_ptr.vmem [resolvable:$true] %s612_s8 }
  0x29   :  { %321 = vmatpush.bf16.msra.mxu1 %v816_v1  ;;  %v814_v5 = vld [vmem:[#allocation5 + $0x68] sm:$0xff]  ;;  %v824_v6 = vld [vmem:[#allocation8 + $0x38] sm:$0xff]  ;;  %v823_v7 = vld [vmem:[#allocation8 + $0x30] sm:$0xff] }
  0x2a   :  { %410 = vmatpush.bf16.msra.mxu2 %v824_v6  ;;  %v805_v8 = vld [vmem:[#allocation5 + $0x20] sm:$0xff]  ;;  %v822_v10 = vld [vmem:[#allocation8 + $0x28] sm:$0xff]  ;;  %v804_v11 = vld [vmem:[#allocation5 + $0x18] sm:$0xff] }
  0x2b   :  { %v813_v9 = vld [vmem:[#allocation5 + $0x60] sm:$0xff]  ;;  %v812_v12 = vld [vmem:[#allocation5 + $0x58] sm:$0xff]  ;;  %v803_v13 = vld [vmem:[#allocation5 + $0x10] sm:$0xff] }
  0x2c   :  { %308 = vmatpush.bf16.msra.mxu0 %v807_v2  ;;  %v811_v14 = vld [vmem:[#allocation5 + $0x50] sm:$0xff]  ;;  %v802_v15 = vld [vmem:[#allocation5 + $0x8] sm:$0xff]  ;;  %v801_v17 = vld [vmem:[#allocation5] sm:$0xff] }
  0x2d   :  { %322 = vmatpush.bf16.msra.mxu1 %v815_v3  ;;  %v810_v16 = vld [vmem:[#allocation5 + $0x48] sm:$0xff]  ;;  %v809_v18 = vld [vmem:[#allocation5 + $0x40] sm:$0xff]  ;;  %v633_v19 = vld [vmem:[#allocation2] sm:$0xf] }
  0x2e   :  { %411 = vmatpush.bf16.msra.mxu2 %v823_v7  ;;  %v800_v20 = vld [vmem:[#allocation2 + $0x4] sm:$0xf0]  ;;  %v799_v21 = vld [vmem:[#allocation2 + $0x4] sm:$0xf]  ;;  %v635_v22 = vld [vmem:[#allocation2 + $0x8] sm:$0xf0] }
  0x2f   :  { %v634_v23 = vor.u32 %v800_v20, %v633_v19  ;;  %v638_v24 = vor.u32 %v799_v21, %v635_v22  ;;  %v821_v25 = vld [vmem:[#allocation8 + $0x20] sm:$0xff]  ;;  %v820_v26 = vld [vmem:[#allocation8 + $0x18] sm:$0xff]  ;;  %v819_v27 = vld [vmem:[#allocation8 + $0x10] sm:$0xff] }
  0x30   :  { %309 = vmatpush.bf16.msra.mxu0 %v806_v4  ;;  %v818_v28 = vld [vmem:[#allocation8 + $0x8] sm:$0xff]  ;;  %v817_v29 = vld [vmem:[#allocation8] sm:$0xff]  ;;  %v831_v31 = vld [vmem:[#allocation11 + $0x30] sm:$0xff] }
  0x31   :  { %323 = vmatpush.bf16.msra.mxu1 %v814_v5  ;;  %v832_v30 = vld [vmem:[#allocation11 + $0x38] sm:$0xff]  ;;  %v199_v32 = vld [vmem:[#allocation7] sm:$0xff]  ;;  %v830_v33 = vld [vmem:[#allocation11 + $0x28] sm:$0xff] }
  0x32   :  { %412 = vmatpush.bf16.msra.mxu2 %v822_v10  ;;  %501 = vmatpush.bf16.msra.mxu3 %v832_v30  ;;  %v200_v34 = vperm.slane %v199_v32, 0  ;;  %v337_v41 = vperm.slane %v199_v32, 1  ;;  %v340_v47 = vperm.slane %v199_v32, 2  ;;  %v829_v52 = vld [vmem:[#allocation11 + $0x20] sm:$0xff]  ;;  %v828_v53 = vld [vmem:[#allocation11 + $0x18] sm:$0xff]  ;;  %v827_v54 = vld [vmem:[#allocation11 + $0x10] sm:$0xff] }
  0x33   :  { %v826_v55 = vld [vmem:[#allocation11 + $0x8] sm:$0xff]  ;;  %v825_v56 = vld [vmem:[#allocation11] sm:$0xff]  ;;  %v839_v58 = vld [vmem:[#allocation14 + $0x30] sm:$0xff] }
  0x34   :  { %310 = vmatpush.bf16.msra.mxu0 %v805_v8  ;;  %v840_v57 = vld [vmem:[#allocation14 + $0x38] sm:$0xff]  ;;  %v360_v59 = vld [vmem:[#allocation10] sm:$0xff]  ;;  %v838_v60 = vld [vmem:[#allocation14 + $0x28] sm:$0xff] }
  0x35   :  { %324 = vmatpush.bf16.msra.mxu1 %v813_v9  ;;  %v361_v61 = vperm.slane %v360_v59, 0  ;;  %v426_v1 = vperm.slane %v360_v59, 1  ;;  %v429_v4 = vperm.slane %v360_v59, 2 }
  0x36   :  { %413 = vmatpush.bf16.msra.mxu2 %v821_v25  ;;  %502 = vmatpush.bf16.msra.mxu3 %v831_v31 }
  0x38   :  { %311 = vmatpush.bf16.msra.mxu0 %v804_v11 }
  0x39   :  { %325 = vmatpush.bf16.msra.mxu1 %v812_v12 }
  0x3a   :  { %414 = vmatpush.bf16.msra.mxu2 %v820_v26  ;;  %503 = vmatpush.bf16.msra.mxu3 %v830_v33 }
  0x3c   :  { %312 = vmatpush.bf16.msra.mxu0 %v803_v13  ;;  %v837_v13 = vld [vmem:[#allocation14 + $0x20] sm:$0xff] }
  0x3d   :  { %326 = vmatpush.bf16.msra.mxu1 %v811_v14  ;;  %v836_v14 = vld [vmem:[#allocation14 + $0x18] sm:$0xff] }
  0x3e   :  { %415 = vmatpush.bf16.msra.mxu2 %v819_v27  ;;  %504 = vmatpush.bf16.msra.mxu3 %v829_v52 }
  0x40   :  { %313 = vmatpush.bf16.msra.mxu0 %v802_v15  ;;  %v835_v15 = vld [vmem:[#allocation14 + $0x10] sm:$0xff] }
  0x41   :  { %327 = vmatpush.bf16.msra.mxu1 %v810_v16  ;;  %v834_v16 = vld [vmem:[#allocation14 + $0x8] sm:$0xff] }
  0x42   :  { %416 = vmatpush.bf16.msra.mxu2 %v818_v28  ;;  %505 = vmatpush.bf16.msra.mxu3 %v828_v53 }
  0x44   :  { %314 = vmatpush.bf16.msra.mxu0 %v801_v17  ;;  %v833_v17 = vld [vmem:[#allocation14] sm:$0xff] }
  0x45   :  { %328 = vmatpush.bf16.msra.mxu1 %v809_v18  ;;  %v451_v18 = vld [vmem:[#allocation13] sm:$0xff] }
  0x46   :  { %417 = vmatpush.bf16.msra.mxu2 %v817_v29  ;;  %506 = vmatpush.bf16.msra.mxu3 %v827_v54  ;;  %v452_v19 = vperm.slane %v451_v18, 0  ;;  %v520_v26 = vperm.slane %v451_v18, 2 }
  0x47   :  { %315 = vmatmul.bf16.vlgmr.msra.gmra.mxu0 %v634_v23  ;;  %v517_v23 = vperm.slane %v451_v18, 1 }
  0x48   :  { %329 = vmatmul.bf16.vlgmr.msra.gmra.mxu1 %v638_v24  ;;  %592 = vmatpush.bf16.msrb.mxu0 %v840_v57 }
  0x4a   :  { %507 = vmatpush.bf16.msra.mxu3 %v826_v55 }
  0x4c   :  { %593 = vmatpush.bf16.msrb.mxu0 %v839_v58 }
  0x4e   :  { %508 = vmatpush.bf16.msra.mxu3 %v825_v56 }
  0x50   :  { %594 = vmatpush.bf16.msrb.mxu0 %v838_v60 }
  0x54   :  { %595 = vmatpush.bf16.msrb.mxu0 %v837_v13 }
  0x58   :  { %596 = vmatpush.bf16.msrb.mxu0 %v836_v14 }
  0x5c   :  { %597 = vmatpush.bf16.msrb.mxu0 %v835_v15 }
  0x60   :  { %598 = vmatpush.bf16.msrb.mxu0 %v834_v16 }
  0x64   :  { %599 = vmatpush.bf16.msrb.mxu0 %v833_v17 }
  0xc4   :  { %v316_v35 = vpop.f32.mrf.mxu0 }
  0xc5   :  { %v330_v36 = vpop.f32.mrf.mxu1  ;;  %v317_v37 = vadd.f32 %v316_v35, %v200_v34  ;;  %v542_v35 = vld [vmem:[#allocation16] sm:$0xff] }
  0xc7   :  { %v331_v38 = vadd.f32 %v330_v36, %v317_v37  ;;  %v543_v36 = vperm.slane %v542_v35, 0 }
  0xc9   :  { %v335_v40 = vmax.f32 %v331_v38, 0.0 }
  0xcb   :  { %v338_v45 = vmul.f32 %v337_v41, %v335_v40 }
  0xcc   :  { %v318_v39 = vpop.f32.mrf.mxu0 }
  0xcd   :  { %v319_v42 = vadd.f32 %v318_v39, %v200_v34  ;;  %v332_v43 = vpop.f32.mrf.mxu1  ;;  %v341_v49 = vadd.f32 %v340_v47, %v338_v45 }
  0xcf   :  { %v333_v44 = vadd.f32 %v332_v43, %v319_v42 }
  0xd1   :  { %v336_v46 = vmax.f32 %v333_v44, 0.0 }
  0xd3   :  { %v339_v48 = vmul.f32 %v337_v41, %v336_v46 }
  0xd5   :  { %v342_v50 = vadd.f32 %v340_v47, %v339_v48 }
  0xd7   :  { %v343_v51 = vpack.c.bf16 %v342_v50, %v341_v49 }
  0xd9   :  { %418 = vmatmul.bf16.vlgmr.msra.gmra.mxu2 %v343_v51 }
 0x15c   :  { %v419_v62 = vpop.f32.mrf.mxu2 }
 0x15d   :  { %v420_v63 = vadd.f32 %v419_v62, %v361_v61 }
 0x15f   :  { %v424_v0 = vmax.f32 %v420_v63, 0.0 }
 0x161   :  { %v427_v3 = vmul.f32 %v426_v1, %v424_v0 }
 0x163   :  { %v430_v7 = vadd.f32 %v429_v4, %v427_v3 }
 0x164   :  { %v421_v2 = vpop.f32.mrf.mxu2 }
 0x165   :  { %v422_v5 = vadd.f32 %v421_v2, %v361_v61  ;;  %v432_v10 = vadd.f32 %v430_v7, %v341_v49 }
 0x167   :  { %v425_v6 = vmax.f32 %v422_v5, 0.0 }
 0x169   :  { %v428_v8 = vmul.f32 %v426_v1, %v425_v6 }
 0x16b   :  { %v431_v9 = vadd.f32 %v429_v4, %v428_v8 }
 0x16d   :  { %v433_v11 = vadd.f32 %v431_v9, %v342_v50 }
 0x16f   :  { %v434_v12 = vpack.c.bf16 %v433_v11, %v432_v10 }
 0x171   :  { %509 = vmatmul.bf16.vlgmr.msra.gmra.mxu3 %v434_v12 }
 0x1f4   :  { %v510_v20 = vpop.f32.mrf.mxu3 }
 0x1f5   :  { %v511_v21 = vadd.f32 %v510_v20, %v452_v19 }
 0x1f7   :  { %v515_v22 = vmax.f32 %v511_v21, 0.0 }
 0x1f9   :  { %v518_v25 = vmul.f32 %v517_v23, %v515_v22 }
 0x1fb   :  { %v521_v29 = vadd.f32 %v520_v26, %v518_v25 }
 0x1fc   :  { %v512_v24 = vpop.f32.mrf.mxu3 }
 0x1fd   :  { %v513_v27 = vadd.f32 %v512_v24, %v452_v19  ;;  %v523_v32 = vadd.f32 %v521_v29, %v432_v10 }
 0x1ff   :  { %v516_v28 = vmax.f32 %v513_v27, 0.0 }
 0x201   :  { %v519_v30 = vmul.f32 %v517_v23, %v516_v28 }
 0x203   :  { %v522_v31 = vadd.f32 %v520_v26, %v519_v30 }
 0x205   :  { %v524_v33 = vadd.f32 %v522_v31, %v433_v11 }
 0x207   :  { %v525_v34 = vpack.c.bf16 %v524_v33, %v523_v32 }
 0x209   :  { %600 = vmatmul.bf16.vlgmr.msrb.gmra.mxu0 %v525_v34 }
 0x286   :  { %v601_v37 = vpop.f32.mrf.mxu0 }
 0x287   :  { %v602_v38 = vadd.f32 %v601_v37, %v543_v36 }
 0x289   :  { %606 = vst [vmem:[#allocation17] sm:$0xff] %v602_v38 }
 0x28e   :  { %v603_v39 = vpop.f32.mrf.mxu0 }
 0x28f   :  { %v604_v40 = vadd.f32 %v603_v39, %v543_v36 }
 0x291   :  { %607 = vst [vmem:[#allocation17 + $0x8] sm:$0xff] %v604_v40 }
 0x292   :  { %620 = dma.vmem_to_hbm [thread:$0]  %s613_s8, 256, %s615_s30, [#allocation4], %s1114_s14, %s1114_s14, %s1115_s15  }
 0x293   :  { %1105 = dma.done.wait [#allocation4], 256  }
 0x294   :  { %1106 = vsyncadd [#allocation4], 4294967040 }
 0x295   :  { %625 = vsyncpa [#allocation3], 1 }
 0x296   :  { %626 = vsyncpa [#allocation6], 1 }
 0x297   :  { %627 = vsyncpa [#allocation9], 1 }
 0x298   :  { %628 = vsyncpa [#allocation12], 1 }
 0x299   :  { %629 = vsyncpa [#allocation15], 1 }
 0x29a   :  { %630 = vsyncpa [#allocation4], 1 }

</bundles_post_ra>
